<compile_context>
chip_gen: v6e
topology: v6e:2x2x1
jax: 0.10.0
libtpu: 0.0.40
codegen_flags: <defaults>
</compile_context>

<pallas_src>
import jax
import jax.numpy as jnp
from jax.experimental import pallas as pl
from jax.experimental.pallas import tpu as pltpu


def _chomp_copy_kernel(x_ref, o_ref):
    # Static slice of the Ref view (zero-cost).  In the lane-tiled regime the
    # input and output blocks have identical widths, so this is an identity
    # copy; in the full-width regime it drops the chomped tail.
    o_ref[...] = x_ref[:, : o_ref.shape[-1]]


def _round_up(v: int, m: int) -> int:
    return ((v + m - 1) // m) * m


def _chomp_rows(
    x2: jax.Array,
    out_len: int,
    *,
    tile_budget_bytes: int = 4 * 1024 * 1024,  # combined in+out bytes per block
) -> jax.Array:
    """Chomp the last axis of a 2-D (rows, L) array down to out_len columns."""
    rows, l = x2.shape
    itemsize = jnp.dtype(x2.dtype).itemsize
    # Sublane packing requirement for the second-to-last block dim.
    sub = {4: 8, 2: 16, 1: 32}.get(itemsize, 8)

    # ---- lane (last-dim) blocking -------------------------------------------
    full_width_row_bytes = (l + out_len) * itemsize
    if out_len < 128 or sub * full_width_row_bytes <= tile_budget_bytes:
        # Full-width blocks: block lane dims equal the full array dims (always
        # legal); one grid step per row tile; lane-dense stores; the chomped
        # tail is sliced off inside the kernel.
        in_lane, out_lane = l, out_len
        lane_grid = 1
        bytes_per_row = full_width_row_bytes
    else:
        # Very long sequences: lane-tile.  Minimize padding waste in the last
        # (partial) lane block; prefer fatter blocks on ties.
        candidates = [t for t in (2048, 1024, 512, 384, 256, 128) if t <= out_len]
        tl = min(candidates, key=lambda t: ((-out_len) % t, -t))
        in_lane = out_lane = tl
        lane_grid = pl.cdiv(out_len, tl)
        bytes_per_row = 2 * tl * itemsize

    # ---- row blocking ---------------------------------------------------------
    if rows <= sub:
        tr = rows  # full-dim block (always legal)
        row_grid = 1
    else:
        tr = max(sub, tile_budget_bytes // bytes_per_row)
        tr = (tr // sub) * sub
        # Guarantee >= 2 row blocks so the "parallel" row axis can be sharded
        # across both TensorCores on v7x even for small N*C.
        half = _round_up(pl.cdiv(rows, 2), sub)
        tr = max(sub, min(tr, half, 8192))
        row_grid = pl.cdiv(rows, tr)

    # Advisory cost: one read of the input + one write of the output.
    bytes_accessed = rows * (l + out_len) * itemsize

    return pl.pallas_call(
        _chomp_copy_kernel,
        out_shape=jax.ShapeDtypeStruct((rows, out_len), x2.dtype),
        grid=(row_grid, lane_grid),
        in_specs=[pl.BlockSpec((tr, in_lane), lambda r, c: (r, c))],
        out_specs=pl.BlockSpec((tr, out_lane), lambda r, c: (r, c)),
        compiler_params=pltpu.CompilerParams(
            # Row axis parallel (megacore sharding), lane axis arbitrary so the
            # writeback of each row tile stays in order.
            dimension_semantics=("parallel", "arbitrary"),
            # 2 buffers x (in tile + out tile) <= ~16 MiB with the defaults;
            # 32 MiB is comfortably below physical VMEM on v5e/v6e (128 MiB)
            # and v7x (64 MiB), and above v5e's 16 MiB default scoped limit.
            vmem_limit_bytes=32 * 1024 * 1024,
        ),
        cost_estimate=pl.CostEstimate(
            flops=0, transcendentals=0, bytes_accessed=bytes_accessed
        ),
    )(x2)


def chomp1d(x: jax.Array, chomp_size: int) -> jax.Array:
    """Pallas implementation of Chomp1d.forward: x[:, :, :-chomp_size]."""
    assert x.ndim == 3, "expected (N, C, L) input"
    n, c, l = x.shape
    # PyTorch's x[:, :, :-0] would return an empty tensor; we require a real chomp.
    assert 0 < chomp_size < l, "need 0 < chomp_size < L (matches x[:, :, :-c])"
    out_len = l - chomp_size

    # Collapse (N, C) into one row axis (free for contiguous NCL layout).
    x2 = x.reshape(n * c, l)
    y2 = _chomp_rows(x2, out_len)
    return y2.reshape(n, c, out_len)


if __name__ == "__main__":
    key = jax.random.PRNGKey(0)

    # 1) Small TCN-style case: (batch, channels, seq) = (2, 4, 16), chomp 3.
    N, C, L, chomp = 2, 4, 16, 3
    x = jax.random.normal(key, (N, C, L), dtype=jnp.float32)
    out = jax.block_until_ready(chomp1d(x, chomp))
    ref = x[:, :, :-chomp]
    assert out.shape == (N, C, L - chomp), out.shape
    assert out.dtype == x.dtype
    assert jnp.array_equal(out, ref), "Mismatch vs. reference slice (small case)"

    # 2) Larger case exercising the default full-width path with multiple row
    #    blocks (rows > sublane pack -> megacore split) and a non-multiple-of-128
    #    output width (lane-dense full-dim output block).
    N2, C2, L2, chomp2 = 2, 8, 384, 11
    x2 = jax.random.normal(jax.random.PRNGKey(0), (N2, C2, L2), dtype=jnp.float32)
    out2 = jax.block_until_ready(chomp1d(x2, chomp2))
    assert out2.shape == (N2, C2, L2 - chomp2), out2.shape
    assert jnp.array_equal(out2, x2[:, :, :-chomp2]), "Mismatch (full-width case)"

    # 3) Force the lane-tiled fallback with a tiny tile budget: small
    #    chomp_size, out_len % tl large, and the last input lane block reading
    #    past L (locks in Pallas' OOB-read-padding / OOB-write-dropping behavior
    #    flagged in the review).
    N3, C3, L3, chomp3 = 2, 8, 131, 1
    x3 = jax.random.normal(jax.random.PRNGKey(0), (N3, C3, L3), dtype=jnp.float32)
    y3 = _chomp_rows(
        x3.reshape(N3 * C3, L3), L3 - chomp3, tile_budget_bytes=8 * 1024
    )
    out3 = jax.block_until_ready(y3.reshape(N3, C3, L3 - chomp3))
    assert jnp.array_equal(out3, x3[:, :, :-chomp3]), "Mismatch (lane-tiled case)"

    print("KERNEL_OK")
</pallas_src>

<mosaic_0001>
module attributes {stable_mosaic.version = 11 : i64} {
  func.func @_chomp_copy_kernel(%arg0: i32, %arg1: i32, %arg2: memref<8x16xf32, #tpu.memory_space<vmem>>, %arg3: memref<8x13xf32, #tpu.memory_space<vmem>>) attributes {dimension_semantics = [#tpu.dimension_semantics<parallel>, #tpu.dimension_semantics<arbitrary>], iteration_bounds = array<i64: 1, 1>, scalar_prefetch = 0 : i64, scratch_operands = 0 : i64, tpu.core_type = #tpu.core_type<tc>, window_params = [{transform_indices = @transform_0, window_bounds = array<i64: 8, 16>}, {transform_indices = @transform_1, window_bounds = array<i64: 8, 13>}]} {
    %c0 = arith.constant 0 : index
    %c0_0 = arith.constant 0 : index
    %0 = vector.load %arg2[%c0, %c0_0] : memref<8x16xf32, #tpu.memory_space<vmem>>, vector<8x13xf32>
    %c0_1 = arith.constant 0 : index
    %c0_2 = arith.constant 0 : index
    %1 = vector.load %arg3[%c0_1, %c0_2] : memref<8x13xf32, #tpu.memory_space<vmem>>, vector<8x13xf32>
    tpu.vector_store %arg3[%c0_1, %c0_2], %0 {strides = array<i32>} : memref<8x13xf32, #tpu.memory_space<vmem>>, vector<8x13xf32>,
    return
  }
  func.func @transform_0(%arg0: i32, %arg1: i32) -> (i32, i32) {
    %c0_i32 = arith.constant 0 : i32
    return %arg0, %arg1 : i32, i32
  }
  func.func @transform_1(%arg0: i32, %arg1: i32) -> (i32, i32) {
    %c0_i32 = arith.constant 0 : i32
    return %arg0, %arg1 : i32, i32
  }
}

</mosaic_0001>

<bundles_post_ra>
// kernel: tpu_custom_call.1
= control target key start
LH: loop header
LB: loop body
LE: loop exit
PB: predicated region body
PF: predicated region fallthrough
CT: control target
= control target key end

     0   :  { %6 = vsyncpa [#allocation3], 0  ;;  %s103_s0 = inlined_call_operand.hbm [shape: f32[8,16], index: 0, kind: input, shape index: {}]   ;;  %s104_s1 = inlined_call_operand.hbm [shape: f32[8,13], index: 1, kind: output, shape index: {}]  }
   0x1   :  { %7 = vsyncpa [#allocation4], 0  ;;  %s85_s6 = smov [#allocation2]  }
   0x2   :  { %s14_s7 = sshll.u32 %s85_s6, 4  ;;  %s15_s7 = int_to_ptr.vmem [resolvable:$true] %s14_s7 }
   0x3   :  { %s49_s8 = scalar_lea.vmem %s15_s7, 128  ;;  %p54_p1 = scmp.lt.s32.totalorder %s15_s7, %s15_s7 }
   0x4   :  { %p50_p0 = scmp.ne.s32.totalorder %s15_s7, %s49_s8  ;;  %p55_p2 = scmp.lt.s32.totalorder %s49_s8, %s49_s8 }
   0x6   :  { %p56_p3 = por %p55_p2, %p54_p1 }
   0x8   :  { %p57_p4 = pnand %p56_p3, %p50_p0 }
   0xa   :  { %60 = shalt.err (!%p57_p4)
}
   0xb   :  { %17 = dma.hbm_to_vmem [thread:$0]  %s103_s0, 128, %s15_s7, [#allocation3]  }
   0xc   :  { %81 = dma.done.wait [#allocation3], 128  }
   0xd   :  { %82 = vsyncadd [#allocation3], 4294967168  ;;  %s86_s11 = smov [#allocation5]   ;;  %vm22_vm0 = vcmask 105472   ;;  %v21_v0 = vld [vmem:[#allocation2] sm:$0xff] }
   0xe   :  { %s30_s12 = sshll.u32 %s86_s11, 4  ;;  %23 = vst.msk [vmem:[#allocation5] sm:$0xff] %vm22_vm0, %v21_v0  ;;  %s31_s12 = int_to_ptr.vmem [resolvable:$true] %s30_s12 }
   0xf   :  { %s61_s13 = scalar_lea.vmem %s31_s12, 128  ;;  %p66_p6 = scmp.lt.s32.totalorder %s31_s12, %s31_s12 }
  0x10   :  { %p62_p5 = scmp.ne.s32.totalorder %s31_s12, %s61_s13  ;;  %p67_p7 = scmp.lt.s32.totalorder %s61_s13, %s61_s13 }
  0x12   :  { %p68_p8 = por %p67_p7, %p66_p6 }
  0x14   :  { %p69_p9 = pnand %p68_p8, %p62_p5 }
  0x16   :  { %72 = shalt.err (!%p69_p9)
}
  0x17   :  { %33 = dma.vmem_to_hbm [thread:$0]  %s31_s12, 128, %s104_s1, [#allocation4]  }
  0x18   :  { %83 = dma.done.wait [#allocation4], 128  }
  0x19   :  { %84 = vsyncadd [#allocation4], 4294967168 }
  0x1a   :  { %37 = vsyncpa [#allocation3], 1 }
  0x1b   :  { %38 = vsyncpa [#allocation4], 1 }

</bundles_post_ra>
